<compile_context>
chip_gen: v5e
topology: v5e:2x2
jax: 0.10.0
libtpu: 0.0.40
codegen_flags: <defaults>
</compile_context>

<pallas_src>
import functools

import jax
import jax.numpy as jnp
from jax.experimental import pallas as pl
from jax.experimental.pallas import tpu as pltpu


# ----------------------------- Pallas kernel ------------------------------ #
def _odef_mlp_kernel(xt_ref, m1x_ref, m1e_ref, b1_ref, w2_ref, b2_ref,
                     w3_ref, b3_ref, o_ref, *, n_cont, act_dtype):
    tb = xt_ref.shape[1]

    # Layer 1, continuous part: (x - mean)/std is folded into m1x, and m1x has
    # 3 zero columns for the categorical rows -> one K=(n_cont+3) matmul,
    # no slicing of the input block.
    z1 = jnp.dot(m1x_ref[...], xt_ref[...],
                 preferred_element_type=jnp.float32)              # (H1, TB)

    # Layer 1, embedding part: one-hot @ stacked 24-row LUT.  Each table owns
    # its own 8-sublane group, so the one-hot is ONE compare per group.
    k8 = jax.lax.broadcasted_iota(jnp.int32, (8, tb), 0)
    i1 = xt_ref[n_cont:n_cont + 1, :].astype(jnp.int32)   # trunc == .long()
    i2 = xt_ref[n_cont + 1:n_cont + 2, :].astype(jnp.int32)
    i3 = xt_ref[n_cont + 2:n_cont + 3, :].astype(jnp.int32)
    oh = jnp.concatenate([k8 == i1, k8 == i2, k8 == i3],
                         axis=0).astype(jnp.float32)              # (24, TB)
    z1 = z1 + jnp.dot(m1e_ref[...], oh, preferred_element_type=jnp.float32)
    z1 = z1 + b1_ref[...]

    # Hidden layers, lane-dense [features, batch] so tanh / bias-add / stores
    # use full 128-lane vregs.  act_dtype=bf16 halves EUP cost on v6e/v7x.
    h = jnp.tanh(z1.astype(act_dtype))
    z2 = jnp.dot(w2_ref[...], h, preferred_element_type=jnp.float32) + b2_ref[...]
    h2 = jnp.tanh(z2.astype(act_dtype))
    o_ref[...] = (jnp.dot(w3_ref[...], h2, preferred_element_type=jnp.float32)
                  + b3_ref[...]).astype(o_ref.dtype)


# ------------------------ one-time parameter folding ----------------------- #
def prepare_odef_params(params):
    """Fold normalization + embedding tables into kernel-ready weights."""
    w1 = params["w1"]                                  # (20, H1)  [in, out]
    n_cont = params["mean"].shape[0]
    e1d = params["cult_emb"].shape[1]
    e2d = params["soil_emb"].shape[1]
    e3d = params["cover_emb"].shape[1]
    h1 = w1.shape[1]

    inv_std = 1.0 / params["std"]
    w1c = w1[:n_cont]                                  # (n_cont, H1)
    o1, o2 = n_cont, n_cont + e1d
    o3 = o2 + e2d

    # Normalization folded into the continuous weights + 3 zero rows so the
    # categorical columns of the transposed input ride through the same matmul.
    m1x = jnp.concatenate([w1c * inv_std[:, None],
                           jnp.zeros((3, h1), jnp.float32)], axis=0).T  # (H1, 13)

    # Each embedding table folded into a LUT (rows = table entries), padded to
    # 8 rows so every table owns one sublane group of the stacked 24-row LUT.
    def lut(emb, w_rows):
        assert emb.shape[0] <= 8, "table must fit an 8-sublane group"
        l = emb @ w_rows                                              # (rows, H1)
        pad = 8 - l.shape[0]
        if pad:
            l = jnp.concatenate([l, jnp.zeros((pad, h1), jnp.float32)], axis=0)
        return l

    m1e = jnp.concatenate([lut(params["cult_emb"], w1[o1:o2]),
                           lut(params["soil_emb"], w1[o2:o3]),
                           lut(params["cover_emb"], w1[o3:o3 + e3d])],
                          axis=0).T                                   # (H1, 24)

    b1 = (params["b1"].reshape(-1) - (params["mean"] * inv_std) @ w1c)[:, None]

    return dict(
        m1x=m1x, m1e=m1e, b1=b1,
        w2t=params["w2"].T, b2=params["b2"].reshape(-1)[:, None],
        w3t=params["w3"].T, b3=params["b3"].reshape(-1)[:, None],
    )


# ----------------------------- tiling helpers ------------------------------ #
def _round_up(v, m):
    return ((v + m - 1) // m) * m


def _choose_tile(batch, tile_b):
    tile_b = max(128, (int(tile_b) // 128) * 128)    # keep the lane axis 128-aligned
    if batch <= tile_b:
        if batch <= 512:
            return batch                 # one small block (block dim == full dim is legal)
        # split into >=2 grid steps so both v7x TensorCores get work
        return min(tile_b, _round_up(-(-batch // 2), 128))
    return tile_b


# ------------------------------- wrapper ----------------------------------- #
def multy_layer_odef_forward(t, x, prep, *, tile_b=32768, act_dtype=jnp.float32):
    """Forward pass of MultyLayerODEF.  x: [B, n_cont + 3] float32 -> [B, 2]."""
    del t  # unused, as in the PyTorch module

    n_feat = prep["m1x"].shape[1]          # n_cont + 3
    n_cont = n_feat - 3
    h1 = prep["m1x"].shape[0]
    h2 = prep["w2t"].shape[0]
    out_dim = prep["w3t"].shape[0]
    B = x.shape[0]

    # The ONLY wrapper-side prep: one fused XLA transpose to the lane-dense
    # [features, batch] layout the kernel consumes (normalization / offsets /
    # ids handling are all folded into the weights or done in-kernel).
    xt = x.T                                                        # (n_feat, B)

    TB = _choose_tile(B, tile_b)
    grid = (pl.cdiv(B, TB),)               # ragged last block masked by Pallas

    w_args = (prep["m1x"], prep["m1e"], prep["b1"],
              prep["w2t"], prep["b2"], prep["w3t"], prep["b3"])
    # Weights/biases: full-array VMEM blocks, constant index_map -> resident.
    w_specs = [pl.BlockSpec(w.shape, lambda i: (0, 0)) for w in w_args]

    cost = pl.CostEstimate(
        flops=2 * B * (n_feat * h1 + 24 * h1 + h1 * h2 + h2 * out_dim),
        transcendentals=B * (h1 + h2),
        bytes_accessed=4 * (B * (n_feat + out_dim)
                            + sum(int(w.size) for w in w_args)),
    )

    kernel = functools.partial(_odef_mlp_kernel, n_cont=n_cont, act_dtype=act_dtype)

    out_t = pl.pallas_call(
        kernel,
        out_shape=jax.ShapeDtypeStruct((out_dim, B), jnp.float32),
        grid=grid,
        in_specs=[pl.BlockSpec((n_feat, TB), lambda i: (0, i))] + w_specs,
        out_specs=pl.BlockSpec((out_dim, TB), lambda i: (0, i)),
        compiler_params=pltpu.CompilerParams(
            dimension_semantics=("parallel",),        # v7x: shard batch over 2 TCs
            vmem_limit_bytes=64 * 1024 * 1024),
        cost_estimate=cost,
    )(xt, *w_args)

    return out_t.T                          # back to the PyTorch (B, 2) layout


# --------------------------- parameter creation ----------------------------- #
def init_params(key, layers=(32, 32), embs=(4, 3, 3), n_cont=10):
    """Deterministic synthetic parameters matching MultyLayerODEF.__init__."""
    ks = jax.random.split(key, 12)
    in_dim = 10 + 10  # as in the PyTorch module
    h1, h2 = layers

    def linear(kw, kb, fan_in, fan_out):
        bound = 1.0 / jnp.sqrt(fan_in)
        w = jax.random.uniform(kw, (fan_in, fan_out), jnp.float32, -bound, bound)
        b = jax.random.uniform(kb, (1, fan_out), jnp.float32, -bound, bound)
        return w, b

    w1, b1 = linear(ks[0], ks[1], in_dim, h1)
    w2, b2 = linear(ks[2], ks[3], h1, h2)
    w3, b3 = linear(ks[4], ks[5], h2, 2)

    return dict(
        w1=w1, b1=b1, w2=w2, b2=b2, w3=w3, b3=b3,
        cult_emb=jax.random.normal(ks[6], (7, embs[0]), jnp.float32),
        soil_emb=jax.random.normal(ks[7], (7, embs[1]), jnp.float32),
        cover_emb=jax.random.normal(ks[8], (8, embs[2]), jnp.float32),
        mean=jax.random.normal(ks[9], (n_cont,), jnp.float32),
        std=jnp.abs(jax.random.normal(ks[10], (n_cont,), jnp.float32)) + 0.5,
    )


# --------------------------- pure-JAX reference ----------------------------- #
def reference_forward(t, x, params):
    del t
    hp = jax.lax.Precision.HIGHEST
    n_cont = params["mean"].shape[0]
    e1 = x[:, -3].astype(jnp.int32)
    e2 = x[:, -2].astype(jnp.int32)
    e3 = x[:, -1].astype(jnp.int32)
    xc = (x[:, :n_cont] - params["mean"]) / params["std"]
    h = jnp.concatenate([xc,
                         jnp.take(params["cult_emb"], e1, axis=0),
                         jnp.take(params["soil_emb"], e2, axis=0),
                         jnp.take(params["cover_emb"], e3, axis=0)], axis=-1)
    h = jnp.tanh(jnp.dot(h, params["w1"], precision=hp) + params["b1"])
    h = jnp.tanh(jnp.dot(h, params["w2"], precision=hp) + params["b2"])
    return jnp.dot(h, params["w3"], precision=hp) + params["b3"]


# --------------------------------- main ------------------------------------ #
if __name__ == "__main__":
    key = jax.random.PRNGKey(0)
    (k_p, k_x, k_e1, k_e2, k_e3, k_t,
     k_x2, k_f1, k_f2, k_f3) = jax.random.split(key, 10)

    n_cont = 10
    params = init_params(k_p, layers=(32, 32), embs=(4, 3, 3), n_cont=n_cont)
    prep = prepare_odef_params(params)      # one-time constant fold
    t = jax.random.normal(k_t, ())          # unused by forward

    def make_x(kx, k1, k2, k3, batch):
        # continuous features + 3 categorical index columns stored as floats,
        # exactly like the PyTorch module expects before .long()
        xc = jax.random.normal(kx, (batch, n_cont), jnp.float32)
        i1 = jax.random.randint(k1, (batch, 1), 0, 7).astype(jnp.float32)
        i2 = jax.random.randint(k2, (batch, 1), 0, 7).astype(jnp.float32)
        i3 = jax.random.randint(k3, (batch, 1), 0, 8).astype(jnp.float32)
        return jnp.concatenate([xc, i1, i2, i3], axis=-1)        # [batch, 13]

    # --- small single-block run -------------------------------------------
    fwd = jax.jit(multy_layer_odef_forward)
    x = make_x(k_x, k_e1, k_e2, k_e3, 8)
    out = jax.block_until_ready(fwd(t, x, prep))
    assert out.shape == (8, 2) and out.dtype == jnp.float32
    err = float(jnp.max(jnp.abs(out - reference_forward(t, x, params))))
    assert err < 1e-3, f"mismatch vs reference: {err}"

    # --- multi-step grid with a ragged last block (masked edge path) -------
    fwd_small = jax.jit(functools.partial(multy_layer_odef_forward, tile_b=128))
    x2 = make_x(k_x2, k_f1, k_f2, k_f3, 300)          # grid = 3, last block ragged
    out2 = jax.block_until_ready(fwd_small(t, x2, prep))
    assert out2.shape == (300, 2)
    err2 = float(jnp.max(jnp.abs(out2 - reference_forward(t, x2, params))))
    assert err2 < 1e-3, f"ragged-grid mismatch vs reference: {err2}"

    print("KERNEL_OK")
</pallas_src>

<mosaic_0001>
module attributes {stable_mosaic.version = 11 : i64} {
  func.func @_odef_mlp_kernel(%arg0: i32, %arg1: memref<13x8xf32, #tpu.memory_space<vmem>>, %arg2: memref<32x13xf32, #tpu.memory_space<vmem>>, %arg3: memref<32x24xf32, #tpu.memory_space<vmem>>, %arg4: memref<32x1xf32, #tpu.memory_space<vmem>>, %arg5: memref<32x32xf32, #tpu.memory_space<vmem>>, %arg6: memref<32x1xf32, #tpu.memory_space<vmem>>, %arg7: memref<2x32xf32, #tpu.memory_space<vmem>>, %arg8: memref<2x1xf32, #tpu.memory_space<vmem>>, %arg9: memref<2x8xf32, #tpu.memory_space<vmem>>) attributes {dimension_semantics = [#tpu.dimension_semantics<parallel>], iteration_bounds = array<i64: 1>, scalar_prefetch = 0 : i64, scratch_operands = 0 : i64, tpu.core_type = #tpu.core_type<tc>, window_params = [{transform_indices = @transform_0, window_bounds = array<i64: 13, 8>}, {pipeline_mode = #tpu.pipeline_mode<synchronous>, transform_indices = @transform_1, window_bounds = array<i64: 32, 13>}, {pipeline_mode = #tpu.pipeline_mode<synchronous>, transform_indices = @transform_2, window_bounds = array<i64: 32, 24>}, {pipeline_mode = #tpu.pipeline_mode<synchronous>, transform_indices = @transform_3, window_bounds = array<i64: 32, 1>}, {pipeline_mode = #tpu.pipeline_mode<synchronous>, transform_indices = @transform_4, window_bounds = array<i64: 32, 32>}, {pipeline_mode = #tpu.pipeline_mode<synchronous>, transform_indices = @transform_5, window_bounds = array<i64: 32, 1>}, {pipeline_mode = #tpu.pipeline_mode<synchronous>, transform_indices = @transform_6, window_bounds = array<i64: 2, 32>}, {pipeline_mode = #tpu.pipeline_mode<synchronous>, transform_indices = @transform_7, window_bounds = array<i64: 2, 1>}, {transform_indices = @transform_8, window_bounds = array<i64: 2, 8>}]} {
    %c0 = arith.constant 0 : index
    %c0_0 = arith.constant 0 : index
    %0 = vector.load %arg2[%c0, %c0_0] : memref<32x13xf32, #tpu.memory_space<vmem>>, vector<32x13xf32>
    %c0_1 = arith.constant 0 : index
    %c0_2 = arith.constant 0 : index
    %1 = vector.load %arg1[%c0_1, %c0_2] : memref<13x8xf32, #tpu.memory_space<vmem>>, vector<13x8xf32>
    %cst = arith.constant dense<0.000000e+00> : vector<32x8xf32>
    %2 = tpu.matmul %0, %1, %cst {dimension_numbers = #tpu.dot_dimension_numbers<[1], [0], [0], [1], [0, 0, 1, 1], [], []>} : vector<32x13xf32>, vector<13x8xf32>, vector<32x8xf32> -> vector<32x8xf32>
    %3 = tpu.iota {dimensions = array<i32: 0>} : vector<8x8xi32>
    %c10 = arith.constant 10 : index
    %c0_3 = arith.constant 0 : index
    %4 = vector.load %arg1[%c10, %c0_3] : memref<13x8xf32, #tpu.memory_space<vmem>>, vector<1x8xf32>
    %5 = arith.fptosi %4 : vector<1x8xf32> to vector<1x8xi32>
    %c11 = arith.constant 11 : index
    %c0_4 = arith.constant 0 : index
    %6 = vector.load %arg1[%c11, %c0_4] : memref<13x8xf32, #tpu.memory_space<vmem>>, vector<1x8xf32>
    %7 = arith.fptosi %6 : vector<1x8xf32> to vector<1x8xi32>
    %c12 = arith.constant 12 : index
    %c0_5 = arith.constant 0 : index
    %8 = vector.load %arg1[%c12, %c0_5] : memref<13x8xf32, #tpu.memory_space<vmem>>, vector<1x8xf32>
    %9 = arith.fptosi %8 : vector<1x8xf32> to vector<1x8xi32>
    %10 = vector.broadcast %5 : vector<1x8xi32> to vector<8x8xi32>
    %11 = arith.cmpi eq, %3, %10 : vector<8x8xi32>
    %12 = vector.broadcast %7 : vector<1x8xi32> to vector<8x8xi32>
    %13 = arith.cmpi eq, %3, %12 : vector<8x8xi32>
    %14 = vector.broadcast %9 : vector<1x8xi32> to vector<8x8xi32>
    %15 = arith.cmpi eq, %3, %14 : vector<8x8xi32>
    %16 = tpu.concatenate %11, %13, %15 in 0 : vector<8x8xi1>, vector<8x8xi1>, vector<8x8xi1> -> vector<24x8xi1>
    %17 = arith.extui %16 : vector<24x8xi1> to vector<24x8xi32>
    %18 = arith.sitofp %17 : vector<24x8xi32> to vector<24x8xf32>
    %c0_6 = arith.constant 0 : index
    %c0_7 = arith.constant 0 : index
    %19 = vector.load %arg3[%c0_6, %c0_7] : memref<32x24xf32, #tpu.memory_space<vmem>>, vector<32x24xf32>
    %cst_8 = arith.constant dense<0.000000e+00> : vector<32x8xf32>
    %20 = tpu.matmul %19, %18, %cst_8 {dimension_numbers = #tpu.dot_dimension_numbers<[1], [0], [0], [1], [0, 0, 1, 1], [], []>} : vector<32x24xf32>, vector<24x8xf32>, vector<32x8xf32> -> vector<32x8xf32>
    %21 = arith.addf %2, %20 : vector<32x8xf32>
    %c0_9 = arith.constant 0 : index
    %c0_10 = arith.constant 0 : index
    %22 = vector.load %arg4[%c0_9, %c0_10] : memref<32x1xf32, #tpu.memory_space<vmem>>, vector<32x1xf32>
    %23 = vector.broadcast %22 : vector<32x1xf32> to vector<32x8xf32>
    %24 = arith.addf %21, %23 : vector<32x8xf32>
    %25 = math.tanh %24 : vector<32x8xf32>
    %c0_11 = arith.constant 0 : index
    %c0_12 = arith.constant 0 : index
    %26 = vector.load %arg5[%c0_11, %c0_12] : memref<32x32xf32, #tpu.memory_space<vmem>>, vector<32x32xf32>
    %cst_13 = arith.constant dense<0.000000e+00> : vector<32x8xf32>
    %27 = tpu.matmul %26, %25, %cst_13 {dimension_numbers = #tpu.dot_dimension_numbers<[1], [0], [0], [1], [0, 0, 1, 1], [], []>} : vector<32x32xf32>, vector<32x8xf32>, vector<32x8xf32> -> vector<32x8xf32>
    %c0_14 = arith.constant 0 : index
    %c0_15 = arith.constant 0 : index
    %28 = vector.load %arg6[%c0_14, %c0_15] : memref<32x1xf32, #tpu.memory_space<vmem>>, vector<32x1xf32>
    %29 = vector.broadcast %28 : vector<32x1xf32> to vector<32x8xf32>
    %30 = arith.addf %27, %29 : vector<32x8xf32>
    %31 = math.tanh %30 : vector<32x8xf32>
    %c0_16 = arith.constant 0 : index
    %c0_17 = arith.constant 0 : index
    %32 = vector.load %arg7[%c0_16, %c0_17] : memref<2x32xf32, #tpu.memory_space<vmem>>, vector<2x32xf32>
    %cst_18 = arith.constant dense<0.000000e+00> : vector<2x8xf32>
    %33 = tpu.matmul %32, %31, %cst_18 {dimension_numbers = #tpu.dot_dimension_numbers<[1], [0], [0], [1], [0, 0, 1, 1], [], []>} : vector<2x32xf32>, vector<32x8xf32>, vector<2x8xf32> -> vector<2x8xf32>
    %c0_19 = arith.constant 0 : index
    %c0_20 = arith.constant 0 : index
    %34 = vector.load %arg8[%c0_19, %c0_20] : memref<2x1xf32, #tpu.memory_space<vmem>>, vector<2x1xf32>
    %35 = vector.broadcast %34 : vector<2x1xf32> to vector<2x8xf32>
    %36 = arith.addf %33, %35 : vector<2x8xf32>
    %c0_21 = arith.constant 0 : index
    %c0_22 = arith.constant 0 : index
    %37 = vector.load %arg9[%c0_21, %c0_22] : memref<2x8xf32, #tpu.memory_space<vmem>>, vector<2x8xf32>
    tpu.vector_store %arg9[%c0_21, %c0_22], %36 {strides = array<i32>} : memref<2x8xf32, #tpu.memory_space<vmem>>, vector<2x8xf32>,
    return
  }
  func.func @transform_0(%arg0: i32) -> (i32, i32) {
    %c0_i32 = arith.constant 0 : i32
    %c0_i32_0 = arith.constant 0 : i32
    return %c0_i32, %arg0 : i32, i32
  }
  func.func @transform_1(%arg0: i32) -> (i32, i32) {
    %c0_i32 = arith.constant 0 : i32
    %c0_i32_0 = arith.constant 0 : i32
    %c0_i32_1 = arith.constant 0 : i32
    return %c0_i32, %c0_i32_0 : i32, i32
  }
  func.func @transform_2(%arg0: i32) -> (i32, i32) {
    %c0_i32 = arith.constant 0 : i32
    %c0_i32_0 = arith.constant 0 : i32
    %c0_i32_1 = arith.constant 0 : i32
    return %c0_i32, %c0_i32_0 : i32, i32
  }
  func.func @transform_3(%arg0: i32) -> (i32, i32) {
    %c0_i32 = arith.constant 0 : i32
    %c0_i32_0 = arith.constant 0 : i32
    %c0_i32_1 = arith.constant 0 : i32
    return %c0_i32, %c0_i32_0 : i32, i32
  }
  func.func @transform_4(%arg0: i32) -> (i32, i32) {
    %c0_i32 = arith.constant 0 : i32
    %c0_i32_0 = arith.constant 0 : i32
    %c0_i32_1 = arith.constant 0 : i32
    return %c0_i32, %c0_i32_0 : i32, i32
  }
  func.func @transform_5(%arg0: i32) -> (i32, i32) {
    %c0_i32 = arith.constant 0 : i32
    %c0_i32_0 = arith.constant 0 : i32
    %c0_i32_1 = arith.constant 0 : i32
    return %c0_i32, %c0_i32_0 : i32, i32
  }
  func.func @transform_6(%arg0: i32) -> (i32, i32) {
    %c0_i32 = arith.constant 0 : i32
    %c0_i32_0 = arith.constant 0 : i32
    %c0_i32_1 = arith.constant 0 : i32
    return %c0_i32, %c0_i32_0 : i32, i32
  }
  func.func @transform_7(%arg0: i32) -> (i32, i32) {
    %c0_i32 = arith.constant 0 : i32
    %c0_i32_0 = arith.constant 0 : i32
    %c0_i32_1 = arith.constant 0 : i32
    return %c0_i32, %c0_i32_0 : i32, i32
  }
  func.func @transform_8(%arg0: i32) -> (i32, i32) {
    %c0_i32 = arith.constant 0 : i32
    %c0_i32_0 = arith.constant 0 : i32
    return %c0_i32, %arg0 : i32, i32
  }
}

</mosaic_0001>

<bundles_post_ra>
// kernel: multy_layer_odef_forward.1
= control target key start
LH: loop header
LB: loop body
LE: loop exit
PB: predicated region body
PF: predicated region fallthrough
CT: control target
= control target key end

     0   :  { %v36_v0 = vlaneseq  ;;  %vm115_vm0 = vcmask 1044480   ;;  %vm102_vm4 = vcmask 105472   ;;  %v389_v21 = vmov 0   ;;  %s534_s0 = inlined_call_operand.vmem [shape: f32[13,8], index: 0, kind: input, shape index: {}]   ;;  %s535_s1 = inlined_call_operand.vmem [shape: f32[32,13], index: 1, kind: input, shape index: {}]   ;;  %s536_s2 = inlined_call_operand.vmem [shape: f32[32,24], index: 2, kind: input, shape index: {}]   ;;  %s537_s3 = inlined_call_operand.vmem [shape: f32[32,1], index: 3, kind: input, shape index: {}]   ;;  %s538_s4 = inlined_call_operand.vmem [shape: f32[32,32], index: 4, kind: input, shape index: {}]   ;;  %s539_s5 = inlined_call_operand.vmem [shape: f32[32,1], index: 5, kind: input, shape index: {}]   ;;  %s540_s6 = inlined_call_operand.vmem [shape: f32[2,32], index: 6, kind: input, shape index: {}]   ;;  %s541_s7 = inlined_call_operand.vmem [shape: f32[2,1], index: 7, kind: input, shape index: {}]   ;;  %s542_s8 = inlined_call_operand.hbm [shape: f32[2,8], index: 8, kind: output, shape index: {}]  }
   0x1   :  { %v42_v1 = vld [vmem:[%s534_s0 + $0xc] sm:$0x1]  ;;  %v40_v2 = vld [vmem:[%s534_s0 + $0xb] sm:$0x1]  ;;  %v38_v6 = vld [vmem:[%s534_s0 + $0xa] sm:$0x1]  ;;  %345 = vset.pattern.permute.xlu1 %v389_v21  ;;  %344 = vset.pattern.permute.xlu0 %v389_v21 }
   0x2   :  { %vm336_vm1 = vcmp.lt.s32.totalorder %v42_v1, 0  ;;  %v337_v3 = vceil.f32 %v42_v1  ;;  %v338_v4 = vfloor.f32 %v42_v1  ;;  %vm331_vm2 = vcmp.lt.s32.totalorder %v40_v2, 0  ;;  %v35_v5 = vld [vmem:[%s534_s0 + $0x8] sm:$0x1f]  ;;  %v34_v9 = vld [vmem:[%s534_s0] sm:$0xff]  ;;  %v151_v18 = vld [vmem:[%s537_s3 + $0x18] sm:$0xff]  ;;  %346 = vset.pattern.permute.xlu2 %v389_v21 }
   0x3   :  { %v332_v7 = vceil.f32 %v40_v2  ;;  %v333_v8 = vfloor.f32 %v40_v2  ;;  %312 = vmatpush.msk.msra.mxu1 %vm115_vm0, %v35_v5  ;;  %vm326_vm3 = vcmp.lt.s32.totalorder %v38_v6, 0  ;;  %v30_v10 = vld [vmem:[%s535_s1] sm:$0xff]  ;;  %v37_v11 = vshrl.u32 %v36_v0, 7  ;;  %v149_v15 = vld [vmem:[%s537_s3 + $0x8] sm:$0xff]  ;;  %169 = vperm.xlu0 %344, %v151_v18  }
   0x4   :  { %v339_v12 = vsel %vm336_vm1, %v337_v3, %v338_v4  ;;  %v327_v13 = vceil.f32 %v38_v6  ;;  %v328_v14 = vfloor.f32 %v38_v6  ;;  %159 = vperm.xlu1 %345, %v149_v15  }
   0x5   :  { %v340_v16 = vcvt.f32.s32 %v339_v12  ;;  %v334_v17 = vsel %vm331_vm2, %v332_v7, %v333_v8  ;;  %134 = vmatpush.msra.mxu1 %v34_v9 }
   0x6   :  { %v335_v19 = vcvt.f32.s32 %v334_v17  ;;  %v329_v20 = vsel %vm326_vm3, %v327_v13, %v328_v14  ;;  %313 = vmatmul.msk.f32.vlgmr.msra.gmra.mxu1 %vm102_vm4, %v30_v10 }
   0x7   :  { %v48_v22 = vperm.slane %v340_v16, 0  ;;  %v330_v23 = vcvt.f32.s32 %v329_v20 }
   0x8   :  { %v46_v24 = vperm.slane %v335_v19, 0 }
   0x9   :  { %13 = vsyncpa [#allocation3], 0  ;;  %vm49_vm5 = vcmp.eq.s32.totalorder %v37_v11, %v48_v22  ;;  %v44_v25 = vperm.slane %v330_v23, 0  ;;  %v390_v26 = vmov 1.0   ;;  %v31_v27 = vld [vmem:[%s535_s1 + $0x8] sm:$0xff]  ;;  %v56_v28 = vld [vmem:[%s536_s2] sm:$0xff] }
   0xa   :  { %305 = vmatpush.msk.msra.mxu0 %vm49_vm5, %v390_v26  ;;  %vm47_vm6 = vcmp.eq.s32.totalorder %v37_v11, %v46_v24  ;;  %vm60_vm8 = vcmask 195584   ;;  %v148_v29 = vld [vmem:[%s537_s3] sm:$0xff]  ;;  %v150_v30 = vld [vmem:[%s537_s3 + $0x10] sm:$0xff]  ;;  %v57_v32 = vld [vmem:[%s536_s2 + $0x8] sm:$0xff]  ;;  %vm208_vm9 = vcmask 261120   ;;  %s391_s29 = smov [#allocation2]  }
   0xb   :  { %vm45_vm7 = vcmp.eq.s32.totalorder %v37_v11, %v44_v25  ;;  %164 = vperm.xlu0 %344, %v150_v30   ;;  %v32_v31 = vld [vmem:[%s535_s1 + $0x10] sm:$0xff]  ;;  %v184_v33 = vld [vmem:[%s539_s5] sm:$0xff]  ;;  %v185_v34 = vld [vmem:[%s539_s5 + $0x8] sm:$0xff]  ;;  %s291_s30 = sshll.u32 %s391_s29, 4  ;;  %s293_s11 = sshll.u32 %s542_s8, 4  ;;  %vm284_vm10 = vcmask 58368   ;;  %s292_s30 = int_to_ptr.vmem [resolvable:$true] %s291_s30  ;;  %s294_s11 = int_to_ptr.hbm [resolvable:$true] %s293_s11 }
   0xc   :  { %306 = vmatpush.msk.msra.mxu0 %vm47_vm6, %v390_v26  ;;  %154 = vperm.xlu1 %345, %v148_v29   ;;  %v33_v35 = vld [vmem:[%s535_s1 + $0x18] sm:$0xff]  ;;  %v58_v36 = vld [vmem:[%s536_s2 + $0x10] sm:$0xff]  ;;  %v180_v63 = vld [vmem:[%s538_s4] sm:$0xff] }
   0xd   :  { %v59_v37 = vld [vmem:[%s536_s2 + $0x18] sm:$0xff]  ;;  %v186_v59 = vld [vmem:[%s539_s5 + $0x10] sm:$0xff]  ;;  %v255_v2 = vld [vmem:[%s541_s7] sm:$0x3] }
   0xe   :  { %307 = vmatpush.msk.msra.mxu0 %vm45_vm7, %v390_v26  ;;  %314 = vmatmul.msk.f32.gmra.mxu1 %vm102_vm4, %v31_v27  ;;  %v187_v55 = vld [vmem:[%s539_s5 + $0x18] sm:$0xff]  ;;  %v181_v3 = vld [vmem:[%s538_s4 + $0x8] sm:$0xff]  ;;  %v182_v4 = vld [vmem:[%s538_s4 + $0x10] sm:$0xff] }
   0xf   :  { %308 = vmatmul.msk.f32.vlgmr.msra.gmra.mxu0 %vm60_vm8, %v56_v28  ;;  %205 = vperm.xlu2 %346, %v187_v55   ;;  %v183_v0 = vld [vmem:[%s538_s4 + $0x18] sm:$0xff]  ;;  %v254_v20 = vld [vmem:[%s540_s6] sm:$0x3] }
  0x13   :  { %195 = vperm.xlu0 %344, %v185_v34  }
  0x14   :  { %190 = vperm.xlu1 %345, %v184_v33  }
  0x16   :  { %315 = vmatmul.msk.f32.gmra.mxu1 %vm102_vm4, %v32_v31 }
  0x17   :  { %309 = vmatmul.msk.f32.gmra.mxu0 %vm60_vm8, %v57_v32  ;;  %200 = vperm.xlu2 %346, %v186_v59  }
  0x1e   :  { %316 = vmatmul.msk.f32.gmra.mxu1 %vm102_vm4, %v33_v35 }
  0x1f   :  { %310 = vmatmul.msk.f32.gmra.mxu0 %vm60_vm8, %v58_v36  ;;  %258 = vperm.xlu2 %346, %v255_v2  }
  0x27   :  { %311 = vmatmul.msk.f32.gmra.mxu0 %vm60_vm8, %v59_v37 }
  0x69   :  { %v206_v5 = vpop.permute.xlu2 %205 }
  0x71   :  { %v201_v12 = vpop.permute.xlu2 %200 }
  0x75   :  { %v170_v43 = vpop.permute.xlu0 %169 }
  0x76   :  { %v160_v45 = vpop.permute.xlu1 %159 }
  0x79   :  { %v259_v22 = vpop.permute.xlu2 %258 }
  0x7d   :  { %v165_v51 = vpop.permute.xlu0 %164 }
  0x7e   :  { %v155_v56 = vpop.permute.xlu1 %154 }
  0x83   :  { %v136_v38 = vpop.f32.mrf.mxu1 }
  0x85   :  { %v196_v11 = vpop.permute.xlu0 %195 }
  0x86   :  { %v191_v16 = vpop.permute.xlu1 %190 }
  0x8b   :  { %v139_v40 = vpop.f32.mrf.mxu1 }
  0x8c   :  { %v90_v39 = vpop.f32.mrf.mxu0 }
  0x8d   :  { %v137_v52 = vadd.f32 %v136_v38, %v90_v39 }
  0x8f   :  { %v172_v58 = vadd.f32 %v155_v56, %v137_v52 }
  0x93   :  { %v142_v42 = vpop.f32.mrf.mxu1 }
  0x94   :  { %v93_v41 = vpop.f32.mrf.mxu0 }
  0x95   :  { %v140_v49 = vadd.f32 %v139_v40, %v93_v41 }
  0x97   :  { %v173_v57 = vadd.f32 %v160_v45, %v140_v49 }
  0x9b   :  { %v145_v46 = vpop.f32.mrf.mxu1 }
  0x9c   :  { %v96_v44 = vpop.f32.mrf.mxu0 }
  0x9d   :  { %v143_v47 = vadd.f32 %v142_v42, %v96_v44 }
  0x9f   :  { %v174_v53 = vadd.f32 %v165_v51, %v143_v47 }
  0xa4   :  { %v99_v48 = vpop.f32.mrf.mxu0 }
  0xa5   :  { %v146_v50 = vadd.f32 %v145_v46, %v99_v48 }
  0xa7   :  { %v175_v54 = vadd.f32 %v170_v43, %v146_v50 }
  0xa9   :  { %347 = vtanh.f32 %v175_v54 }
  0xaa   :  { %349 = vtanh.f32 %v174_v53 }
  0xab   :  { %351 = vtanh.f32 %v173_v57 }
  0xac   :  { %353 = vtanh.f32 %v172_v58 }
  0xaf   :  { %v348_v60 = vpop.eup %347 }
  0xb0   :  { %233 = vmatpush.msra.mxu2 %v348_v60  ;;  %322 = vmatpush.msra.mxu3 %v348_v60  ;;  %v350_v61 = vpop.eup %349 }
  0xb1   :  { %v352_v62 = vpop.eup %351 }
  0xb2   :  { %234 = vmatpush.msra.mxu2 %v350_v61  ;;  %323 = vmatpush.msra.mxu3 %v350_v61  ;;  %v354_v1 = vpop.eup %353 }
  0xb4   :  { %235 = vmatpush.msra.mxu2 %v352_v62  ;;  %324 = vmatpush.msra.mxu3 %v352_v62 }
  0xb6   :  { %236 = vmatpush.msra.mxu2 %v354_v1  ;;  %325 = vmatpush.msra.mxu3 %v354_v1 }
  0xb7   :  { %317 = vmatmul.msk.f32.vlgmr.msra.gmra.mxu2 %vm208_vm9, %v180_v63  ;;  %320 = vmatmul.msk.f32.vlgmr.msra.gmra.mxu3 %vm208_vm9, %v183_v0 }
  0xbf   :  { %318 = vmatmul.msk.f32.gmra.mxu2 %vm208_vm9, %v181_v3 }
  0xc7   :  { %319 = vmatmul.msk.f32.gmra.mxu2 %vm208_vm9, %v182_v4 }
 0x13a   :  { %v238_v6 = vpop.f32.mrf.mxu2  ;;  %v247_v7 = vpop.f32.mrf.mxu3 }
 0x13b   :  { %v248_v8 = vadd.f32 %v247_v7, %v206_v5  ;;  %v239_v17 = vadd.f32 %v238_v6, %v191_v16 }
 0x13d   :  { %355 = vtanh.f32 %v248_v8 }
 0x142   :  { %v241_v9 = vpop.f32.mrf.mxu2 }
 0x143   :  { %v356_v10 = vpop.eup %355  ;;  %v242_v14 = vadd.f32 %v241_v9, %v196_v11 }
 0x144   :  { %276 = vmatpush.msrb.mxu3 %v356_v10 }
 0x14a   :  { %v244_v13 = vpop.f32.mrf.mxu2 }
 0x14b   :  { %v245_v15 = vadd.f32 %v244_v13, %v201_v12 }
 0x14d   :  { %357 = vtanh.f32 %v245_v15 }
 0x14e   :  { %359 = vtanh.f32 %v242_v14 }
 0x14f   :  { %361 = vtanh.f32 %v239_v17 }
 0x153   :  { %v358_v18 = vpop.eup %357 }
 0x154   :  { %277 = vmatpush.msrb.mxu3 %v358_v18  ;;  %v360_v19 = vpop.eup %359 }
 0x155   :  { %v362_v21 = vpop.eup %361 }
 0x156   :  { %278 = vmatpush.msrb.mxu3 %v360_v19 }
 0x158   :  { %279 = vmatpush.msrb.mxu3 %v362_v21 }
 0x159   :  { %321 = vmatmul.msk.f32.vlgmr.msrb.gmra.mxu3 %vm208_vm9, %v254_v20 }
 0x1dc   :  { %v281_v23 = vpop.f32.mrf.mxu3 }
 0x1dd   :  { %v282_v24 = vadd.f32 %v281_v23, %v259_v22 }
 0x1df   :  { %285 = vst.msk [vmem:[#allocation2] sm:$0x3] %vm284_vm10, %v282_v24 }
 0x1e0   :  { %296 = dma.vmem_to_hbm [thread:$0]  %s292_s30, 32, %s294_s11, [#allocation3]  }
 0x1e1   :  { %387 = dma.done.wait [#allocation3], 32  }
 0x1e2   :  { %388 = vsyncadd [#allocation3], 4294967264 }
 0x1e3   :  { %301 = vsyncpa [#allocation3], 1 }

</bundles_post_ra>
